<compile_context>
chip_gen: v7x
topology: tpu7x:2x2x1
jax: 0.10.0
libtpu: 0.0.40
codegen_flags: <defaults>
</compile_context>

<pallas_src>
import jax
import jax.numpy as jnp
import numpy as np
from jax.experimental import pallas as pl
from jax.experimental.pallas import tpu as pltpu

IN_FEATURES = 465
OUT_FEATURES = 2
DEFAULT_TILE_B = 2048   # max rows per grid step; ~10 MiB peak VMEM, v5e-safe


def _round_up(n, m):
    return ((n + m - 1) // m) * m


def _discriminator_kernel(x_ref, w_ref, b_ref, o_ref):
    # x_ref: (TILE_B, 465) VMEM        w_ref: (1, 465) VMEM (lane-dense diff)
    # b_ref: (1, 1) SMEM scalar        o_ref: (TILE_B, 2) VMEM
    x = x_ref[...].astype(jnp.float32)   # accepts bf16 activations too
    w = w_ref[...]
    b = b_ref[0, 0]

    # Logit difference d = z1 - z0 = x @ (w1 - w0) + (b1 - b0).
    d = jnp.sum(x * w, axis=-1, keepdims=True) + b            # (TILE_B, 1)

    # softmax([z0, z1]) == [1 - sigmoid(d), sigmoid(d)]  (exact, no NaN risk)
    p1 = 1.0 / (1.0 + jnp.exp(-d))                            # (TILE_B, 1)
    col = jax.lax.broadcasted_iota(jnp.int32, o_ref.shape, 1)
    o_ref[...] = jnp.where(col == 1, p1, 1.0 - p1).astype(o_ref.dtype)


def prepare_discriminator_params(weight, bias):
    """One-time parameter prep (hoisted out of the per-call hot path).

    Args:
      weight: (2, 465) float32 — PyTorch nn.Linear weight layout.
      bias:   (2,)     float32.
    Returns:
      w_diff: (1, 465) lane-dense difference weight (w1 - w0).
      b_diff: (1, 1)   bias difference scalar (b1 - b0), placed in SMEM.
    """
    w_diff = (weight[1, :] - weight[0, :]).reshape(1, IN_FEATURES)
    b_diff = (bias[1] - bias[0]).reshape(1, 1)
    return w_diff.astype(jnp.float32), b_diff.astype(jnp.float32)


def discriminator_forward(x, w_diff, b_diff, constant=1.0,
                          tile_b=DEFAULT_TILE_B):
    """Pallas forward pass of Discriminator: softmax(Linear(465, 2)(x)).

    Args:
      x:       (B, 465) float32 (or bfloat16) input.
      w_diff:  (1, 465) float32 — from prepare_discriminator_params.
      b_diff:  (1, 1)   float32 — from prepare_discriminator_params.
      constant: grad-reverse scale (unused in forward; kept for API parity).
      tile_b:  max batch tile size (rows per grid step).
    Returns:
      (B, 2) float32 softmax probabilities.
    """
    del constant  # GradReverse is identity in the forward pass
    B = x.shape[0]

    # Adaptive tile: aim for >= 2 grid steps (keeps both v7x TCs busy with
    # dimension_semantics=("parallel",)), multiple of 8 sublanes, capped at
    # tile_b for VMEM headroom.  No host padding: cdiv grid + Pallas masking
    # of the ragged last block (reads padded, writes clipped; rows are
    # independent so overhang garbage is harmless).
    tb = min(int(tile_b), _round_up(pl.cdiv(B, 2), 8))
    tb = max(tb, 8)
    grid = (pl.cdiv(B, tb),)

    cost = pl.CostEstimate(
        flops=2 * B * IN_FEATURES,
        transcendentals=B,
        bytes_accessed=(B * IN_FEATURES * x.dtype.itemsize
                        + (B * OUT_FEATURES + IN_FEATURES + 1) * 4),
    )

    return pl.pallas_call(
        _discriminator_kernel,
        out_shape=jax.ShapeDtypeStruct((B, OUT_FEATURES), jnp.float32),
        grid=grid,
        in_specs=[
            # x: pipelined batch tiles (double-buffered by Pallas).
            pl.BlockSpec((tb, IN_FEATURES), lambda i: (i, 0)),
            # difference weight: lane-dense, resident across all tiles.
            pl.BlockSpec((1, IN_FEATURES), lambda i: (0, 0)),
            # bias difference: SMEM scalar (no padded VMEM tile, no vreg cost).
            pl.BlockSpec(memory_space=pltpu.MemorySpace.SMEM),
        ],
        out_specs=pl.BlockSpec((tb, OUT_FEATURES), lambda i: (i, 0)),
        compiler_params=pltpu.CompilerParams(
            dimension_semantics=("parallel",),
            vmem_limit_bytes=32 * 1024 * 1024,
        ),
        cost_estimate=cost,
    )(x, w_diff, b_diff)


def _init_params(key):
    # Deterministic synthetic init mimicking nn.Linear(465, 2):
    # PyTorch uses U(-1/sqrt(fan_in), 1/sqrt(fan_in)).
    kw, kb = jax.random.split(key)
    bound = 1.0 / float(np.sqrt(IN_FEATURES))
    weight = jax.random.uniform(
        kw, (OUT_FEATURES, IN_FEATURES), jnp.float32, -bound, bound)
    bias = jax.random.uniform(
        kb, (OUT_FEATURES,), jnp.float32, -bound, bound)
    return weight, bias


def _ref_forward(x, weight, bias):
    # float64 host reference: softmax(x @ W.T + b, axis=1)
    xn = np.asarray(x, np.float64)
    wn = np.asarray(weight, np.float64)
    bn = np.asarray(bias, np.float64)
    z = xn @ wn.T + bn
    z -= z.max(axis=1, keepdims=True)
    e = np.exp(z)
    return e / e.sum(axis=1, keepdims=True)


if __name__ == "__main__":
    key = jax.random.PRNGKey(0)
    k_params, k_x1, k_x2, k_x3 = jax.random.split(key, 4)

    weight, bias = _init_params(k_params)
    w_diff, b_diff = prepare_discriminator_params(weight, bias)

    fwd = jax.jit(discriminator_forward, static_argnames=("tile_b",))

    # batch=2: single tiny tile (ragged block, grid=(1,)).
    # batch=8: exact single tile.
    # batch=1000: multi-tile "parallel" grid with a ragged last block
    #             (tb=504 -> blocks of 504 + 496), no host padding.
    for k_x, batch in ((k_x1, 2), (k_x2, 8), (k_x3, 1000)):
        x = jax.random.normal(k_x, (batch, IN_FEATURES), jnp.float32)
        out = jax.block_until_ready(fwd(x, w_diff, b_diff, 0.5))

        ref = _ref_forward(x, weight, bias)
        assert out.shape == (batch, OUT_FEATURES)
        assert np.allclose(np.asarray(out), ref, atol=5e-5, rtol=1e-4)
        assert np.allclose(np.asarray(out).sum(axis=1), 1.0, atol=1e-5)

    print("KERNEL_OK")
</pallas_src>

<mosaic_0001>
module attributes {stable_mosaic.version = 11 : i64} {
  func.func @_discriminator_kernel(%arg0: i32, %arg1: memref<8x465xf32, #tpu.memory_space<vmem>>, %arg2: memref<1x465xf32, #tpu.memory_space<vmem>>, %arg3: memref<1x1xf32, #tpu.memory_space<smem>>, %arg4: memref<8x2xf32, #tpu.memory_space<vmem>>) attributes {dimension_semantics = [#tpu.dimension_semantics<parallel>], iteration_bounds = array<i64: 1>, scalar_prefetch = 0 : i64, scratch_operands = 0 : i64, tpu.core_type = #tpu.core_type<tc>, window_params = [{transform_indices = @transform_0, window_bounds = array<i64: 8, 465>}, {pipeline_mode = #tpu.pipeline_mode<synchronous>, transform_indices = @transform_1, window_bounds = array<i64: 1, 465>}, {transform_indices = @transform_2, window_bounds = array<i64: 1, 1>}, {transform_indices = @transform_3, window_bounds = array<i64: 8, 2>}]} {
    %c0 = arith.constant 0 : index
    %c0_0 = arith.constant 0 : index
    %0 = vector.load %arg1[%c0, %c0_0] : memref<8x465xf32, #tpu.memory_space<vmem>>, vector<8x465xf32>
    %c0_1 = arith.constant 0 : index
    %c0_2 = arith.constant 0 : index
    %1 = vector.load %arg2[%c0_1, %c0_2] : memref<1x465xf32, #tpu.memory_space<vmem>>, vector<1x465xf32>
    %c0_3 = arith.constant 0 : index
    %c0_4 = arith.constant 0 : index
    %2 = memref.load %arg3[%c0_3, %c0_4] : memref<1x1xf32, #tpu.memory_space<smem>>
    %3 = vector.broadcast %1 : vector<1x465xf32> to vector<8x465xf32>
    %4 = arith.mulf %0, %3 : vector<8x465xf32>
    %cst = arith.constant dense<0.000000e+00> : vector<8xf32>
    %5 = vector.multi_reduction <add>, %4, %cst [1] : vector<8x465xf32> to vector<8xf32>
    %6 = vector.shape_cast %5 : vector<8xf32> to vector<8x1xf32>
    %7 = vector.broadcast %2 : f32 to vector<8x1xf32>
    %8 = arith.addf %6, %7 : vector<8x1xf32>
    %cst_5 = arith.constant 0.000000e+00 : f32
    %9 = vector.broadcast %cst_5 : f32 to vector<8x1xf32>
    %10 = arith.subf %9, %8 : vector<8x1xf32>
    %11 = math.exp %10 : vector<8x1xf32>
    %cst_6 = arith.constant 1.000000e+00 : f32
    %12 = vector.broadcast %cst_6 : f32 to vector<8x1xf32>
    %13 = arith.addf %12, %11 : vector<8x1xf32>
    %cst_7 = arith.constant 1.000000e+00 : f32
    %14 = vector.broadcast %cst_7 : f32 to vector<8x1xf32>
    %15 = arith.divf %14, %13 : vector<8x1xf32>
    %16 = tpu.iota {dimensions = array<i32: 1>} : vector<8x2xi32>
    %c1_i32 = arith.constant 1 : i32
    %17 = vector.broadcast %c1_i32 : i32 to vector<8x2xi32>
    %18 = arith.cmpi eq, %16, %17 : vector<8x2xi32>
    %cst_8 = arith.constant 1.000000e+00 : f32
    %19 = vector.broadcast %cst_8 : f32 to vector<8x1xf32>
    %20 = arith.subf %19, %15 : vector<8x1xf32>
    %21 = vector.shape_cast %15 : vector<8x1xf32> to vector<8x1xf32>
    %22 = vector.broadcast %21 : vector<8x1xf32> to vector<8x2xf32>
    %23 = vector.shape_cast %20 : vector<8x1xf32> to vector<8x1xf32>
    %24 = vector.broadcast %23 : vector<8x1xf32> to vector<8x2xf32>
    %25 = arith.select %18, %22, %24 : vector<8x2xi1>, vector<8x2xf32>
    %c0_9 = arith.constant 0 : index
    %c0_10 = arith.constant 0 : index
    %26 = vector.load %arg4[%c0_9, %c0_10] : memref<8x2xf32, #tpu.memory_space<vmem>>, vector<8x2xf32>
    tpu.vector_store %arg4[%c0_9, %c0_10], %25 {strides = array<i32>} : memref<8x2xf32, #tpu.memory_space<vmem>>, vector<8x2xf32>,
    return
  }
  func.func @transform_0(%arg0: i32) -> (i32, i32) {
    %c0_i32 = arith.constant 0 : i32
    %c0_i32_0 = arith.constant 0 : i32
    return %arg0, %c0_i32 : i32, i32
  }
  func.func @transform_1(%arg0: i32) -> (i32, i32) {
    %c0_i32 = arith.constant 0 : i32
    %c0_i32_0 = arith.constant 0 : i32
    %c0_i32_1 = arith.constant 0 : i32
    return %c0_i32, %c0_i32_0 : i32, i32
  }
  func.func @transform_2(%arg0: i32) -> (i32, i32) {
    %c0_i32 = arith.constant 0 : i32
    %c0_i32_0 = arith.constant 0 : i32
    %c0_i32_1 = arith.constant 0 : i32
    return %c0_i32, %c0_i32_0 : i32, i32
  }
  func.func @transform_3(%arg0: i32) -> (i32, i32) {
    %c0_i32 = arith.constant 0 : i32
    %c0_i32_0 = arith.constant 0 : i32
    return %arg0, %c0_i32 : i32, i32
  }
}

</mosaic_0001>

<bundles_post_ra>
// kernel: discriminator_forward.1
= control target key start
LH: loop header
LB: loop body
LE: loop exit
PB: predicated region body
PF: predicated region fallthrough
CT: control target
= control target key end

     0   :  { %9 = vsyncpa [#allocation4], 0  ;;  %s296_s0 = inlined_call_operand.hbm [shape: f32[2,465], index: 0, kind: input, shape index: {}]   ;;  %s297_s1 = inlined_call_operand.vmem [shape: f32[1,465], index: 1, kind: input, shape index: {}]   ;;  %s298_s2 = inlined_call_operand.<no memory space> [shape: f32[1,1], index: 2, kind: input, shape index: {}]   ;;  %s299_s3 = inlined_call_operand.hbm [shape: f32[2,2], index: 3, kind: output, shape index: {}]  }
   0x1   :  { %10 = vsyncpa [#allocation5], 0 }
   0x2   :  { %15 = vsyncadd [#allocation4], 384  ;;  %s239_s12 = smov [#allocation3]   ;;  %s191_s16 = scalar_lea.hbm %s296_s0, 128 }
   0x3   :  { %s16_s13 = sshll.u32 %s239_s12, 4  ;;  %p192_p0 = scmp.ne.s32.totalorder %s296_s0, %s191_s16  ;;  %s17_s13 = int_to_ptr.vmem [resolvable:$true] %s16_s13 }
   0x4   :  { %p195_p1 = scmp.lt.u32.totalorder %s191_s16, %s296_s0 }
   0x6   :  { %p197_p2 = pnand %p195_p1, %p192_p0 }
   0x8   :  { %200 = shalt.err (!%p197_p2)
}
   0x9   :  { %s201_s21 = scalar_lea.vmem %s17_s13, 128  ;;  %s205_s22 = scalar_lea.vmem %s17_s13, 512 }
   0xa   :  { %p202_p3 = scmp.ne.s32.totalorder %s17_s13, %s201_s21  ;;  %p206_p4 = scmp.lt.s32.totalorder %s17_s13, %s17_s13 }
   0xb   :  { %p207_p5 = scmp.lt.s32.totalorder %s205_s22, %s201_s21 }
   0xd   :  { %p208_p6 = por %p207_p5, %p206_p4 }
   0xf   :  { %p209_p7 = pnand %p208_p6, %p202_p3 }
  0x11   :  { %212 = shalt.err (!%p209_p7)
}
  0x12   :  { %s240_s23 = smov 128   ;;  %s241_s24 = smov 8  }
  0x13   :  { %22 = dma.hbm_to_vmem [thread:$0]  %s296_s0, 128, %s17_s13, [#allocation4], %s240_s23, %s240_s23, %s241_s24  }
  0x14   :  { %235 = dma.done.wait [#allocation4], 512  }
  0x15   :  { %236 = vsyncadd [#allocation4], 4294966784  ;;  %v37_v0 = vlaneseq  ;;  %v242_v1 = vmov 1983009808   ;;  %v34_v9 = vld [vmem:[%s297_s1] sm:$0xf]  ;;  %v148_v51 = vstv %s298_s2 }
  0x16   :  { %v58_v2 = vunpack.c.l.s4 %v242_v1  ;;  %v30_v19 = vld [vmem:[#allocation3] sm:$0xff]  ;;  %v31_v24 = vld [vmem:[#allocation3 + $0x8] sm:$0xff]  ;;  %v32_v25 = vld [vmem:[#allocation3 + $0x10] sm:$0xff]  ;;  %vm143_vm0 = vcmask 662528   ;;  %vm161_vm2 = vcmask 15360  }
  0x17   :  { %v38_v3 = vshrl.u32 %v37_v0, 7  ;;  %v33_v26 = vld [vmem:[#allocation3 + $0x18] sm:$0xff]  ;;  %v157_v58 = vand.u32 127, %v37_v0 }
  0x18   :  { %v59_v4 = vunpack.c.0.s8 %v58_v2 }
  0x19   :  { %v39_v5 = vsub.s32 0, %v38_v3  ;;  %v43_v6 = vsub.s32 1, %v38_v3  ;;  %v47_v7 = vsub.s32 2, %v38_v3  ;;  %v51_v8 = vsub.s32 3, %v38_v3 }
  0x1a   :  { %v62_v10 = vsub.s32 %v59_v4, %v38_v3  ;;  %vm158_vm1 = vcmp.eq.s32.totalorder %v157_v58, 1 }
  0x1b   :  { %v40_v11 = vrot.slane %v34_v9, %v39_v5  ;;  %v44_v12 = vrot.slane %v34_v9, %v43_v6  ;;  %v48_v13 = vrot.slane %v34_v9, %v47_v7  ;;  %v52_v14 = vrot.slane %v34_v9, %v51_v8 }
  0x1d   :  { %v53_v15 = vcombine.low %v40_v11, %v44_v12  ;;  %v54_v16 = vcombine.high %v40_v11, %v44_v12  ;;  %v55_v17 = vcombine.low %v48_v13, %v52_v14  ;;  %v56_v18 = vcombine.high %v48_v13, %v52_v14 }
  0x1f   :  { %v63_v20 = vrot.slane %v53_v15, %v62_v10  ;;  %v70_v21 = vrot.slane %v54_v16, %v62_v10  ;;  %v77_v22 = vrot.slane %v55_v17, %v62_v10  ;;  %v84_v23 = vrot.slane %v56_v18, %v62_v10 }
  0x21   :  { %v85_v27 = vcombine.low %v63_v20, %v77_v22  ;;  %v86_v28 = vcombine.high %v63_v20, %v77_v22  ;;  %v87_v29 = vcombine.low %v70_v21, %v84_v23  ;;  %v88_v30 = vcombine.high %v70_v21, %v84_v23 }
  0x23   :  { %v93_v31 = vmul.f32 %v85_v27, %v30_v19  ;;  %v94_v32 = vmul.f32 %v86_v28, %v31_v24  ;;  %v95_v33 = vmul.f32 %v87_v29, %v32_v25  ;;  %v96_v34 = vmul.f32 %v88_v30, %v33_v26 }
  0x25   :  { %v101_v35 = vcombine.low %v93_v31, %v94_v32  ;;  %v102_v36 = vcombine.high %v93_v31, %v94_v32  ;;  %v103_v37 = vcombine.low %v95_v33, %v96_v34  ;;  %v104_v38 = vcombine.high %v95_v33, %v96_v34 }
  0x27   :  { %v111_v39 = vrot.slane %v101_v35, %v62_v10  ;;  %v118_v40 = vrot.slane %v102_v36, %v62_v10  ;;  %v125_v41 = vrot.slane %v103_v37, %v62_v10  ;;  %v132_v42 = vrot.slane %v104_v38, %v62_v10 }
  0x29   :  { %v133_v43 = vcombine.low %v111_v39, %v125_v41  ;;  %v134_v44 = vcombine.high %v111_v39, %v125_v41  ;;  %v135_v45 = vcombine.low %v118_v40, %v132_v42  ;;  %v136_v46 = vcombine.high %v118_v40, %v132_v42 }
  0x2b   :  { %v141_v47 = vadd.f32 %v134_v44, %v133_v43  ;;  %v144_v48 = vsel %vm143_vm0, %v136_v46, 0.0 }
  0x2d   :  { %v142_v49 = vadd.f32 %v141_v47, %v135_v45 }
  0x2f   :  { %v145_v50 = vadd.f32 %v144_v48, %v142_v49 }
  0x31   :  { %146 = vadd.xlane.f32.xlu0 %v145_v50 }
  0xbe   :  { %v147_v52 = vpop.xlane.xlu0 %146 }
  0xbf   :  { %v149_v53 = vadd.f32 %v148_v51, %v147_v52 }
  0xc1   :  { %v150_v54 = vsub.f32 0.0, %v149_v53 }
  0xc3   :  { %v151_v55 = vmul.f32 1.442695, %v150_v54 }
  0xc5   :  { %187 = vpow2.f32 %v151_v55 }
  0xcf   :  { %v188_v56 = vpop.eup %187 }
  0xd0   :  { %v153_v57 = vadd.f32 1.0, %v188_v56 }
  0xd2   :  { %189 = vrcp.f32 %v153_v57 }
  0xdc   :  { %v190_v59 = vpop.eup %189 }
  0xdd   :  { %v159_v60 = vsub.f32 1.0, %v190_v59 }
  0xdf   :  { %v160_v61 = vsel %vm158_vm1, %v190_v59, %v159_v60 }
  0xe0   :  { %162 = vst.msk [vmem:[#allocation6] sm:$0xff] %vm161_vm2, %v160_v61 }
  0xe1   :  { %167 = vsyncadd [#allocation5], 96  ;;  %s243_s29 = smov [#allocation6]  }
  0xe2   :  { %s168_s30 = sshll.u32 %s243_s29, 4  ;;  %s169_s30 = int_to_ptr.vmem [resolvable:$true] %s168_s30 }
  0xe3   :  { %s213_s2 = scalar_lea.vmem %s169_s30, 32  ;;  %s217_s4 = scalar_lea.vmem %s169_s30, 128 }
  0xe4   :  { %p214_p8 = scmp.ne.s32.totalorder %s169_s30, %s213_s2  ;;  %p218_p9 = scmp.lt.s32.totalorder %s169_s30, %s169_s30 }
  0xe5   :  { %p219_p10 = scmp.lt.s32.totalorder %s217_s4, %s213_s2 }
  0xe7   :  { %p220_p11 = por %p219_p10, %p218_p9 }
  0xe9   :  { %p221_p12 = pnand %p220_p11, %p214_p8 }
  0xeb   :  { %224 = shalt.err (!%p221_p12)
}
  0xec   :  { %s225_s7 = scalar_lea.hbm %s299_s3, 32 }
  0xed   :  { %p226_p13 = scmp.ne.s32.totalorder %s299_s3, %s225_s7  ;;  %p229_p0 = scmp.lt.u32.totalorder %s225_s7, %s299_s3 }
  0xef   :  { %p231_p1 = pnand %p229_p0, %p226_p13 }
  0xf1   :  { %234 = shalt.err (!%p231_p1)
}
  0xf2   :  { %s244_s12 = smov 32   ;;  %s245_s13 = smov 2  }
  0xf3   :  { %174 = dma.vmem_to_hbm [thread:$0]  %s169_s30, 32, %s299_s3, [#allocation5], %s244_s12, %s244_s12, %s245_s13  }
  0xf4   :  { %237 = dma.done.wait [#allocation5], 128  }
  0xf5   :  { %238 = vsyncadd [#allocation5], 4294967168 }
  0xf6   :  { %178 = vsyncpa [#allocation4], 1 }
  0xf7   :  { %179 = vsyncpa [#allocation5], 1 }

</bundles_post_ra>
